<compile_context>
chip_gen: v7x
topology: tpu7x:2x2x1
jax: 0.10.0
libtpu: 0.0.40
codegen_flags: <defaults>
</compile_context>

<pallas_src>
import functools

import jax
import jax.numpy as jnp
from jax import lax
from jax.experimental import pallas as pl
from jax.experimental.pallas import tpu as pltpu


# ----------------------------------------------------------------------------
# Fused kernel: one grid step == BBLK batch elements.
# ----------------------------------------------------------------------------
def _fused_tts_asr_kernel(flens_ref,                         # scalar prefetch (SMEM)
                          tts_in_ref, prev_emb_ref, tgt_ref,  # per-step batch blocks
                          w_ref, bias_ref,                    # packed shared params
                          out_ref,                            # (1, 8, 128) partials
                          *, n_vocab, bblk):
    base = pl.program_id(0) * bblk

    biases = bias_ref[...]                    # (8, 128) f32: rows 0/1/2 = tts/enc/dec
    b_tts = biases[0:1, :]
    b_enc = biases[1:2, :]
    b_dec = biases[2:3, :]
    w_tts = w_ref[0]                          # (128, 128) bf16 each
    w_enc = w_ref[1]
    w_dec_ctx = w_ref[2]
    w_dec_emb = w_ref[3]

    _, T, D = tts_in_ref.shape

    # --- TTS generate() proxy: per-frame projection + tanh (batch-blocked M) ---
    x = tts_in_ref[...].reshape(bblk * T, D)                   # (BBLK*T, 128) bf16
    after = jnp.tanh(jnp.dot(x, w_tts, preferred_element_type=jnp.float32) + b_tts)

    # --- ASR encoder proxy: per-frame projection + tanh ---
    enc = jnp.tanh(jnp.dot(after.astype(jnp.bfloat16), w_enc,
                           preferred_element_type=jnp.float32) + b_enc)
    enc3 = enc.reshape(bblk, T, D)                             # (BBLK, T, 128) f32

    # --- masked mean context over valid generated frames (only masking point) ---
    frame_iota = lax.broadcasted_iota(jnp.int32, (1, T, D), 1)
    fmask = jnp.concatenate(
        [(frame_iota < flens_ref[base + e]).astype(jnp.float32) for e in range(bblk)],
        axis=0)                                                # (BBLK, T, 128)
    denom = jnp.maximum(jnp.sum(fmask, axis=1, keepdims=True), 1.0)   # (BBLK, 1, 128)
    ctx = jnp.sum(enc3 * fmask, axis=1, keepdims=True) / denom        # (BBLK, 1, 128)
    ctx = ctx.reshape(bblk, D)                                         # (BBLK, 128)

    # --- ASR decoder proxy: context projected once, broadcast over L rows ---
    ctx_proj = jnp.dot(ctx.astype(jnp.bfloat16), w_dec_ctx,
                       preferred_element_type=jnp.float32)             # (BBLK, 128)
    pe = prev_emb_ref[...]                                             # (BBLK, L, 128) bf16
    L = pe.shape[1]
    emb_proj = jnp.dot(pe.reshape(bblk * L, D), w_dec_emb,
                       preferred_element_type=jnp.float32)             # (BBLK*L, 128)
    logits = (emb_proj.reshape(bblk, L, D)
              + ctx_proj[:, None, :]
              + b_dec.reshape(1, 1, D))                                # (BBLK, L, 128)

    # --- masked softmax cross-entropy + accuracy (no materialized one-hot input) ---
    vocab_iota = lax.broadcasted_iota(jnp.int32, (bblk, L, D), 2)
    logits = jnp.where(vocab_iota < n_vocab, logits, jnp.float32(-1e30))

    tgt = tgt_ref[...]                                                 # (BBLK, L, 1), -1 = pad
    tmask = (tgt >= 0).astype(jnp.float32)
    onehot = (vocab_iota == tgt).astype(jnp.float32)

    m = jnp.max(logits, axis=-1, keepdims=True)
    lse = m + jnp.log(jnp.sum(jnp.exp(logits - m), axis=-1, keepdims=True))
    tgt_logit = jnp.sum(onehot * logits, axis=-1, keepdims=True)
    nll = (lse - tgt_logit) * tmask

    is_max = (logits >= m).astype(jnp.float32)
    correct = (jnp.sum(onehot * is_max, axis=-1, keepdims=True) > 0.0)
    correct = correct.astype(jnp.float32) * tmask

    loss_p = jnp.sum(nll)          # partials already reduced over the BBLK elements
    corr_p = jnp.sum(correct)
    cnt_p = jnp.sum(tmask)

    # one lane-dense (8, 128) partial row per grid step:
    # row 0 = loss, row 1 = correct, row 2 = count (broadcast across lanes)
    out_ref[0] = jnp.concatenate(
        [jnp.full((1, 128), loss_p, jnp.float32),
         jnp.full((1, 128), corr_p, jnp.float32),
         jnp.full((1, 128), cnt_p, jnp.float32),
         jnp.zeros((5, 128), jnp.float32)], axis=0)


def tacotron2_asr_fused(flens, tts_in, prev_emb, targets, w_packed, biases,
                        *, n_vocab, bblk=2):
    B, T, D = tts_in.shape
    _, L, _ = prev_emb.shape
    assert D == 128, "feature dims must be lane-padded to 128"
    assert n_vocab <= 128, "softmax assumes a single 128-lane vocab tile"
    assert B % bblk == 0, "batch must be divisible by the batch-block size"
    kernel = functools.partial(_fused_tts_asr_kernel, n_vocab=n_vocab, bblk=bblk)
    out = pl.pallas_call(
        kernel,
        out_shape=jax.ShapeDtypeStruct((B // bblk, 8, 128), jnp.float32),
        grid_spec=pltpu.PrefetchScalarGridSpec(
            num_scalar_prefetch=1,              # flens -> SMEM
            grid=(B // bblk,),
            in_specs=[
                # contiguous batch blocks (length sort removed: contiguous DMAs)
                pl.BlockSpec((bblk, T, 128), lambda i, flens: (i, 0, 0)),
                pl.BlockSpec((bblk, L, 128), lambda i, flens: (i, 0, 0)),
                pl.BlockSpec((bblk, L, 1), lambda i, flens: (i, 0, 0)),
                # packed shared parameters (constant block index -> stays resident)
                pl.BlockSpec((4, 128, 128), lambda i, flens: (0, 0, 0)),
                pl.BlockSpec((8, 128), lambda i, flens: (0, 0)),
            ],
            out_specs=pl.BlockSpec((1, 8, 128), lambda i, flens: (i, 0, 0)),
        ),
        compiler_params=pltpu.CompilerParams(
            dimension_semantics=("parallel",),      # grid length >= 2 (v7x megacore)
            vmem_limit_bytes=32 * 1024 * 1024,      # v7x-safe; raise on v6e for big tiles
        ),
    )(flens, tts_in, prev_emb, targets, w_packed, biases)
    loss_sum = jnp.sum(out[:, 0, 0])
    corr_sum = jnp.sum(out[:, 1, 0])
    cnt = jnp.sum(out[:, 2, 0])
    return loss_sum, corr_sum, cnt


# ----------------------------------------------------------------------------
# Forward pass (host glue in plain JAX, whole hot path in one Pallas kernel).
# ----------------------------------------------------------------------------
if __name__ == "__main__":
    key = jax.random.PRNGKey(0)
    keys = jax.random.split(key, 12)

    B = 4              # batch
    BBLK = 2           # elements fused per grid step -> grid = (2,)
    L_TXT = 8          # Tmax of padded char ids (ys_tts_pad)
    R = 2              # frames generated per char (reduction-factor proxy)
    T = L_TXT * R      # 16 generated mel frames (multiple of 16: clean bf16 reshape)
    V = 16             # char / ASR output vocab
    E_TXT = 32         # char embedding dim
    SPK = 16           # spk_embed_dim
    N_MELS = 16
    H_ENC = 32
    E_DEC = 32
    L_DEC = 16         # unpaired target length (multiple of 16: clean bf16 reshape)
    SOS = V            # sos id for decoder-input embedding
    LANES = 128        # lane-dense padding target

    def pinit(k, shape, scale=0.1):
        return (scale * jax.random.normal(k, shape)).astype(jnp.float32)

    def pad2(a, rows, cols):
        out = jnp.zeros((rows, cols), jnp.float32)
        return out.at[: a.shape[0], : a.shape[1]].set(a)

    # deterministic synthetic "model" parameters
    char_emb = pinit(keys[0], (V, E_TXT))
    w_tts = pinit(keys[1], (E_TXT + SPK, N_MELS))
    b_tts = jnp.zeros((N_MELS,), jnp.float32)
    w_enc = pinit(keys[2], (N_MELS, H_ENC))
    b_enc = jnp.zeros((H_ENC,), jnp.float32)
    dec_emb = pinit(keys[3], (V + 1, E_DEC))
    w_dec = pinit(keys[4], (H_ENC + E_DEC, V))
    b_dec = jnp.zeros((V,), jnp.float32)

    # packed lane-padded bf16 MXU weights: ONE (4,128,128) slab + ONE (8,128) f32 bias
    w_packed = jnp.stack(
        [pad2(w_tts, LANES, LANES),
         pad2(w_enc, LANES, LANES),
         pad2(w_dec[:H_ENC], LANES, LANES),
         pad2(w_dec[H_ENC:], LANES, LANES)], axis=0).astype(jnp.bfloat16)
    biases = jnp.zeros((8, LANES), jnp.float32)
    biases = biases.at[0, :N_MELS].set(b_tts)
    biases = biases.at[1, :H_ENC].set(b_enc)
    biases = biases.at[2, :V].set(b_dec)

    # synthetic unpaired batch (output of unpaired_converter)
    ys_tts_pad = jax.random.randint(keys[5], (B, L_TXT), 0, V).astype(jnp.int32)
    tts_char_olens = jnp.array([L_TXT, L_TXT - 2, L_TXT - 1, L_TXT - 3], jnp.int32)
    unpaired_ys_pad = jax.random.randint(keys[6], (B, L_DEC), 0, V).astype(jnp.int32)
    asr_char_olens = jnp.array([L_DEC, L_DEC - 3, L_DEC - 1, L_DEC - 5], jnp.int32)
    tgt_pos = jnp.arange(L_DEC)[None, :]
    unpaired_ys_pad = jnp.where(tgt_pos < asr_char_olens[:, None],
                                unpaired_ys_pad, -1)           # pad id = -1 (ignore)
    spembs = pinit(keys[7], (B, SPK), scale=1.0)

    # shuffle_spk (deterministic permutation stands in for random.shuffle)
    perm = jax.random.permutation(keys[8], B)
    unpaired_spembs = spembs[perm]

    # --- TTS generate() host glue: embed chars, upsample xR, concat spk, pad, bf16 ---
    emb = jnp.take(char_emb, ys_tts_pad, axis=0)               # (B, L_TXT, E_TXT)
    emb_up = jnp.repeat(emb, R, axis=1)                        # (B, T, E_TXT)
    spk_bc = jnp.broadcast_to(unpaired_spembs[:, None, :], (B, T, SPK))
    tts_in = jnp.concatenate([emb_up, spk_bc], axis=-1)        # (B, T, E_TXT+SPK)
    tts_in = jnp.concatenate(
        [tts_in, jnp.zeros((B, T, LANES - (E_TXT + SPK)), jnp.float32)], axis=-1)
    tts_in = tts_in.astype(jnp.bfloat16)                       # halve dominant HBM read
    flens = (tts_char_olens * R).astype(jnp.int32)             # fake-data lengths
    # NOTE: the descending length sort of the PyTorch code only aided RNN packing;
    # the batch-summed loss/accuracy are permutation-invariant, so it is dropped and
    # the kernel reads contiguous batch blocks.
    # TODO(synk): SpecAug augmentation and filter_data/filter_thre sample filtering of
    # the real generate() have no clean Pallas equivalent; filter_index = all samples.
    # TODO(synk): move the Rx frame repeat + spk concat + lane padding in-kernel to cut
    # input bytes ~5x further at realistic shapes.

    # --- decoder prev-token embedding (host gather), lane-padded, bf16 ---
    prev = jnp.concatenate(
        [jnp.full((B, 1), SOS, jnp.int32), unpaired_ys_pad[:, :-1]], axis=1)
    prev = jnp.where(prev < 0, 0, prev)
    prev_emb = jnp.take(dec_emb, prev, axis=0)                 # (B, L_DEC, E_DEC)
    prev_emb = jnp.concatenate(
        [prev_emb, jnp.zeros((B, L_DEC, LANES - E_DEC), jnp.float32)], axis=-1)
    prev_emb = prev_emb.astype(jnp.bfloat16)

    # integer targets as a vector (no one-hot materialization)
    targets = unpaired_ys_pad.reshape(B, L_DEC, 1).astype(jnp.int32)

    loss_sum, correct_sum, count = tacotron2_asr_fused(
        flens, tts_in, prev_emb, targets, w_packed, biases, n_vocab=V, bblk=BBLK)

    denom = jnp.maximum(count, 1.0)
    tts_asr_loss = loss_sum / denom                            # asr_model.dec loss
    acc = correct_sum / denom                                  # th_accuracy proxy

    # update_asr=False, no tts_batch -> loss = tts_asr_loss
    loss = tts_asr_loss

    loss = jax.block_until_ready(loss)
    acc = jax.block_until_ready(acc)
    assert bool(jnp.isfinite(loss))
    print("KERNEL_OK")
</pallas_src>

<mosaic_0001>
module attributes {stable_mosaic.version = 11 : i64} {
  func.func @_fused_tts_asr_kernel(%arg0: i32, %arg1: memref<4xi32, #tpu.memory_space<smem>>, %arg2: memref<2x16x128xbf16, #tpu.memory_space<vmem>>, %arg3: memref<2x16x128xbf16, #tpu.memory_space<vmem>>, %arg4: memref<2x16x1xi32, #tpu.memory_space<vmem>>, %arg5: memref<4x128x128xbf16, #tpu.memory_space<vmem>>, %arg6: memref<8x128xf32, #tpu.memory_space<vmem>>, %arg7: memref<1x8x128xf32, #tpu.memory_space<vmem>>) attributes {dimension_semantics = [#tpu.dimension_semantics<parallel>], iteration_bounds = array<i64: 2>, scalar_prefetch = 1 : i64, scratch_operands = 0 : i64, tpu.core_type = #tpu.core_type<tc>, window_params = [{transform_indices = @transform_0, window_bounds = array<i64: 2, 16, 128>}, {transform_indices = @transform_1, window_bounds = array<i64: 2, 16, 128>}, {transform_indices = @transform_2, window_bounds = array<i64: 2, 16, 1>}, {pipeline_mode = #tpu.pipeline_mode<synchronous>, transform_indices = @transform_3, window_bounds = array<i64: 4, 128, 128>}, {pipeline_mode = #tpu.pipeline_mode<synchronous>, transform_indices = @transform_4, window_bounds = array<i64: 8, 128>}, {transform_indices = @transform_5, window_bounds = array<i64: 1, 8, 128>}]} {
    %c2_i32 = arith.constant 2 : i32
    %0 = arith.muli %arg0, %c2_i32 : i32
    %c0 = arith.constant 0 : index
    %c0_0 = arith.constant 0 : index
    %1 = vector.load %arg6[%c0, %c0_0] : memref<8x128xf32, #tpu.memory_space<vmem>>, vector<8x128xf32>
    %2 = vector.extract_strided_slice %1 {offsets = [0, 0], sizes = [1, 128], strides = [1, 1]} : vector<8x128xf32> to vector<1x128xf32>
    %3 = vector.extract_strided_slice %1 {offsets = [1, 0], sizes = [1, 128], strides = [1, 1]} : vector<8x128xf32> to vector<1x128xf32>
    %4 = vector.extract_strided_slice %1 {offsets = [2, 0], sizes = [1, 128], strides = [1, 1]} : vector<8x128xf32> to vector<1x128xf32>
    %c0_1 = arith.constant 0 : index
    %c0_2 = arith.constant 0 : index
    %c0_3 = arith.constant 0 : index
    %5 = vector.load %arg5[%c0_1, %c0_2, %c0_3] : memref<4x128x128xbf16, #tpu.memory_space<vmem>>, vector<1x128x128xbf16>
    %6 = vector.shape_cast %5 : vector<1x128x128xbf16> to vector<128x128xbf16>
    %c1 = arith.constant 1 : index
    %c0_4 = arith.constant 0 : index
    %c0_5 = arith.constant 0 : index
    %7 = vector.load %arg5[%c1, %c0_4, %c0_5] : memref<4x128x128xbf16, #tpu.memory_space<vmem>>, vector<1x128x128xbf16>
    %8 = vector.shape_cast %7 : vector<1x128x128xbf16> to vector<128x128xbf16>
    %c2 = arith.constant 2 : index
    %c0_6 = arith.constant 0 : index
    %c0_7 = arith.constant 0 : index
    %9 = vector.load %arg5[%c2, %c0_6, %c0_7] : memref<4x128x128xbf16, #tpu.memory_space<vmem>>, vector<1x128x128xbf16>
    %10 = vector.shape_cast %9 : vector<1x128x128xbf16> to vector<128x128xbf16>
    %c3 = arith.constant 3 : index
    %c0_8 = arith.constant 0 : index
    %c0_9 = arith.constant 0 : index
    %11 = vector.load %arg5[%c3, %c0_8, %c0_9] : memref<4x128x128xbf16, #tpu.memory_space<vmem>>, vector<1x128x128xbf16>
    %12 = vector.shape_cast %11 : vector<1x128x128xbf16> to vector<128x128xbf16>
    %c0_10 = arith.constant 0 : index
    %c0_11 = arith.constant 0 : index
    %c0_12 = arith.constant 0 : index
    %13 = vector.load %arg2[%c0_10, %c0_11, %c0_12] : memref<2x16x128xbf16, #tpu.memory_space<vmem>>, vector<2x16x128xbf16>
    %14 = vector.shape_cast %13 : vector<2x16x128xbf16> to vector<32x128xbf16>
    %cst = arith.constant dense<0.000000e+00> : vector<32x128xf32>
    %15 = tpu.matmul %14, %6, %cst {dimension_numbers = #tpu.dot_dimension_numbers<[1], [0], [0], [1], [0, 0, 1, 1], [], []>} : vector<32x128xbf16>, vector<128x128xbf16>, vector<32x128xf32> -> vector<32x128xf32>
    %16 = vector.broadcast %2 : vector<1x128xf32> to vector<32x128xf32>
    %17 = arith.addf %15, %16 : vector<32x128xf32>
    %18 = math.tanh %17 : vector<32x128xf32>
    %19 = arith.truncf %18 : vector<32x128xf32> to vector<32x128xbf16>
    %cst_13 = arith.constant dense<0.000000e+00> : vector<32x128xf32>
    %20 = tpu.matmul %19, %8, %cst_13 {dimension_numbers = #tpu.dot_dimension_numbers<[1], [0], [0], [1], [0, 0, 1, 1], [], []>} : vector<32x128xbf16>, vector<128x128xbf16>, vector<32x128xf32> -> vector<32x128xf32>
    %21 = vector.broadcast %3 : vector<1x128xf32> to vector<32x128xf32>
    %22 = arith.addf %20, %21 : vector<32x128xf32>
    %23 = math.tanh %22 : vector<32x128xf32>
    %24 = vector.shape_cast %23 : vector<32x128xf32> to vector<2x16x128xf32>
    %25 = tpu.iota {dimensions = array<i32: 1>} : vector<1x16x128xi32>
    %c0_i32 = arith.constant 0 : i32
    %26 = arith.addi %0, %c0_i32 : i32
    %27 = arith.index_cast %26 : i32 to index
    %28 = memref.load %arg1[%27] : memref<4xi32, #tpu.memory_space<smem>>
    %29 = vector.broadcast %28 : i32 to vector<1x16x128xi32>
    %30 = arith.cmpi slt, %25, %29 : vector<1x16x128xi32>
    %31 = arith.extui %30 : vector<1x16x128xi1> to vector<1x16x128xi32>
    %32 = arith.sitofp %31 : vector<1x16x128xi32> to vector<1x16x128xf32>
    %c1_i32 = arith.constant 1 : i32
    %33 = arith.addi %0, %c1_i32 : i32
    %34 = arith.index_cast %33 : i32 to index
    %35 = memref.load %arg1[%34] : memref<4xi32, #tpu.memory_space<smem>>
    %36 = vector.broadcast %35 : i32 to vector<1x16x128xi32>
    %37 = arith.cmpi slt, %25, %36 : vector<1x16x128xi32>
    %38 = arith.extui %37 : vector<1x16x128xi1> to vector<1x16x128xi32>
    %39 = arith.sitofp %38 : vector<1x16x128xi32> to vector<1x16x128xf32>
    %40 = tpu.concatenate %32, %39 in 0 : vector<1x16x128xf32>, vector<1x16x128xf32> -> vector<2x16x128xf32>
    %cst_14 = arith.constant dense<0.000000e+00> : vector<2x128xf32>
    %41 = vector.multi_reduction <add>, %40, %cst_14 [1] : vector<2x16x128xf32> to vector<2x128xf32>
    %42 = vector.shape_cast %41 : vector<2x128xf32> to vector<2x1x128xf32>
    %cst_15 = arith.constant 1.000000e+00 : f32
    %43 = vector.broadcast %cst_15 : f32 to vector<2x1x128xf32>
    %44 = arith.maximumf %42, %43 : vector<2x1x128xf32>
    %45 = arith.mulf %24, %40 : vector<2x16x128xf32>
    %cst_16 = arith.constant dense<0.000000e+00> : vector<2x128xf32>
    %46 = vector.multi_reduction <add>, %45, %cst_16 [1] : vector<2x16x128xf32> to vector<2x128xf32>
    %47 = vector.shape_cast %46 : vector<2x128xf32> to vector<2x1x128xf32>
    %48 = arith.divf %47, %44 : vector<2x1x128xf32>
    %49 = vector.shape_cast %48 : vector<2x1x128xf32> to vector<2x128xf32>
    %50 = arith.truncf %49 : vector<2x128xf32> to vector<2x128xbf16>
    %cst_17 = arith.constant dense<0.000000e+00> : vector<2x128xf32>
    %51 = tpu.matmul %50, %10, %cst_17 {dimension_numbers = #tpu.dot_dimension_numbers<[1], [0], [0], [1], [0, 0, 1, 1], [], []>} : vector<2x128xbf16>, vector<128x128xbf16>, vector<2x128xf32> -> vector<2x128xf32>
    %c0_18 = arith.constant 0 : index
    %c0_19 = arith.constant 0 : index
    %c0_20 = arith.constant 0 : index
    %52 = vector.load %arg3[%c0_18, %c0_19, %c0_20] : memref<2x16x128xbf16, #tpu.memory_space<vmem>>, vector<2x16x128xbf16>
    %53 = vector.shape_cast %52 : vector<2x16x128xbf16> to vector<32x128xbf16>
    %cst_21 = arith.constant dense<0.000000e+00> : vector<32x128xf32>
    %54 = tpu.matmul %53, %12, %cst_21 {dimension_numbers = #tpu.dot_dimension_numbers<[1], [0], [0], [1], [0, 0, 1, 1], [], []>} : vector<32x128xbf16>, vector<128x128xbf16>, vector<32x128xf32> -> vector<32x128xf32>
    %55 = vector.shape_cast %54 : vector<32x128xf32> to vector<2x16x128xf32>
    %56 = vector.shape_cast %51 : vector<2x128xf32> to vector<2x1x128xf32>
    %57 = vector.broadcast %56 : vector<2x1x128xf32> to vector<2x16x128xf32>
    %58 = arith.addf %55, %57 : vector<2x16x128xf32>
    %59 = vector.shape_cast %4 : vector<1x128xf32> to vector<1x1x128xf32>
    %60 = vector.broadcast %59 : vector<1x1x128xf32> to vector<2x16x128xf32>
    %61 = arith.addf %58, %60 : vector<2x16x128xf32>
    %62 = tpu.iota {dimensions = array<i32: 2>} : vector<2x16x128xi32>
    %c16_i32 = arith.constant 16 : i32
    %63 = vector.broadcast %c16_i32 : i32 to vector<2x16x128xi32>
    %64 = arith.cmpi slt, %62, %63 : vector<2x16x128xi32>
    %cst_22 = arith.constant -1.000000e+30 : f32
    %65 = vector.broadcast %cst_22 : f32 to vector<2x16x128xf32>
    %66 = arith.select %64, %61, %65 : vector<2x16x128xi1>, vector<2x16x128xf32>
    %c0_23 = arith.constant 0 : index
    %c0_24 = arith.constant 0 : index
    %c0_25 = arith.constant 0 : index
    %67 = vector.load %arg4[%c0_23, %c0_24, %c0_25] : memref<2x16x1xi32, #tpu.memory_space<vmem>>, vector<2x16x1xi32>
    %c0_i32_26 = arith.constant 0 : i32
    %68 = vector.broadcast %c0_i32_26 : i32 to vector<2x16x1xi32>
    %69 = arith.cmpi sge, %67, %68 : vector<2x16x1xi32>
    %70 = arith.extui %69 : vector<2x16x1xi1> to vector<2x16x1xi32>
    %71 = arith.sitofp %70 : vector<2x16x1xi32> to vector<2x16x1xf32>
    %72 = vector.broadcast %67 : vector<2x16x1xi32> to vector<2x16x128xi32>
    %73 = arith.cmpi eq, %62, %72 : vector<2x16x128xi32>
    %74 = arith.extui %73 : vector<2x16x128xi1> to vector<2x16x128xi32>
    %75 = arith.sitofp %74 : vector<2x16x128xi32> to vector<2x16x128xf32>
    %cst_27 = arith.constant dense<0xFF800000> : vector<2x16xf32>
    %76 = vector.multi_reduction <maximumf>, %66, %cst_27 [2] : vector<2x16x128xf32> to vector<2x16xf32>
    %77 = vector.shape_cast %76 : vector<2x16xf32> to vector<2x16x1xf32>
    %78 = vector.broadcast %77 : vector<2x16x1xf32> to vector<2x16x128xf32>
    %79 = arith.subf %66, %78 : vector<2x16x128xf32>
    %80 = math.exp %79 : vector<2x16x128xf32>
    %cst_28 = arith.constant dense<0.000000e+00> : vector<2x16xf32>
    %81 = vector.multi_reduction <add>, %80, %cst_28 [2] : vector<2x16x128xf32> to vector<2x16xf32>
    %82 = vector.shape_cast %81 : vector<2x16xf32> to vector<2x16x1xf32>
    %83 = math.log %82 : vector<2x16x1xf32>
    %84 = arith.addf %77, %83 : vector<2x16x1xf32>
    %85 = arith.mulf %75, %66 : vector<2x16x128xf32>
    %cst_29 = arith.constant dense<0.000000e+00> : vector<2x16xf32>
    %86 = vector.multi_reduction <add>, %85, %cst_29 [2] : vector<2x16x128xf32> to vector<2x16xf32>
    %87 = vector.shape_cast %86 : vector<2x16xf32> to vector<2x16x1xf32>
    %88 = arith.subf %84, %87 : vector<2x16x1xf32>
    %89 = arith.mulf %88, %71 : vector<2x16x1xf32>
    %90 = vector.broadcast %77 : vector<2x16x1xf32> to vector<2x16x128xf32>
    %91 = arith.cmpf oge, %66, %90 : vector<2x16x128xf32>
    %92 = arith.extui %91 : vector<2x16x128xi1> to vector<2x16x128xi32>
    %93 = arith.sitofp %92 : vector<2x16x128xi32> to vector<2x16x128xf32>
    %94 = arith.mulf %75, %93 : vector<2x16x128xf32>
    %cst_30 = arith.constant dense<0.000000e+00> : vector<2x16xf32>
    %95 = vector.multi_reduction <add>, %94, %cst_30 [2] : vector<2x16x128xf32> to vector<2x16xf32>
    %96 = vector.shape_cast %95 : vector<2x16xf32> to vector<2x16x1xf32>
    %cst_31 = arith.constant 0.000000e+00 : f32
    %97 = vector.broadcast %cst_31 : f32 to vector<2x16x1xf32>
    %98 = arith.cmpf ogt, %96, %97 : vector<2x16x1xf32>
    %99 = arith.extui %98 : vector<2x16x1xi1> to vector<2x16x1xi32>
    %100 = arith.sitofp %99 : vector<2x16x1xi32> to vector<2x16x1xf32>
    %101 = arith.mulf %100, %71 : vector<2x16x1xf32>
    %102 = vector.shape_cast %89 : vector<2x16x1xf32> to vector<1x2x16x1xf32>
    %cst_32 = arith.constant dense<0.000000e+00> : vector<1xf32>
    %103 = vector.multi_reduction <add>, %102, %cst_32 [1, 2, 3] : vector<1x2x16x1xf32> to vector<1xf32>
    %104 = vector.shape_cast %103 : vector<1xf32> to vector<1x1x1x1xf32>
    %105 = vector.extract %104[0, 0, 0, 0] : f32 from vector<1x1x1x1xf32>
    %106 = vector.shape_cast %101 : vector<2x16x1xf32> to vector<1x2x16x1xf32>
    %cst_33 = arith.constant dense<0.000000e+00> : vector<1xf32>
    %107 = vector.multi_reduction <add>, %106, %cst_33 [1, 2, 3] : vector<1x2x16x1xf32> to vector<1xf32>
    %108 = vector.shape_cast %107 : vector<1xf32> to vector<1x1x1x1xf32>
    %109 = vector.extract %108[0, 0, 0, 0] : f32 from vector<1x1x1x1xf32>
    %110 = vector.shape_cast %71 : vector<2x16x1xf32> to vector<1x2x16x1xf32>
    %cst_34 = arith.constant dense<0.000000e+00> : vector<1xf32>
    %111 = vector.multi_reduction <add>, %110, %cst_34 [1, 2, 3] : vector<1x2x16x1xf32> to vector<1xf32>
    %112 = vector.shape_cast %111 : vector<1xf32> to vector<1x1x1x1xf32>
    %113 = vector.extract %112[0, 0, 0, 0] : f32 from vector<1x1x1x1xf32>
    %114 = vector.broadcast %105 : f32 to vector<1x128xf32>
    %115 = vector.broadcast %109 : f32 to vector<1x128xf32>
    %116 = vector.broadcast %113 : f32 to vector<1x128xf32>
    %cst_35 = arith.constant 0.000000e+00 : f32
    %117 = vector.broadcast %cst_35 : f32 to vector<5x128xf32>
    %118 = tpu.concatenate %114, %115, %116, %117 in 0 : vector<1x128xf32>, vector<1x128xf32>, vector<1x128xf32>, vector<5x128xf32> -> vector<8x128xf32>
    %c0_36 = arith.constant 0 : index
    %c0_37 = arith.constant 0 : index
    %c0_38 = arith.constant 0 : index
    %119 = vector.load %arg7[%c0_36, %c0_37, %c0_38] : memref<1x8x128xf32, #tpu.memory_space<vmem>>, vector<1x8x128xf32>
    %120 = vector.shape_cast %119 : vector<1x8x128xf32> to vector<8x128xf32>
    %121 = vector.shape_cast %118 : vector<8x128xf32> to vector<1x8x128xf32>
    tpu.vector_store %arg7[%c0_36, %c0_37, %c0_38], %121 {strides = array<i32>} : memref<1x8x128xf32, #tpu.memory_space<vmem>>, vector<1x8x128xf32>,
    return
  }
  func.func @transform_0(%arg0: i32, %arg1: memref<4xi32, #tpu.memory_space<smem>>) -> (i32, i32, i32) {
    %c0_i32 = arith.constant 0 : i32
    %c0_i32_0 = arith.constant 0 : i32
    %c0_i32_1 = arith.constant 0 : i32
    return %arg0, %c0_i32, %c0_i32_0 : i32, i32, i32
  }
  func.func @transform_1(%arg0: i32, %arg1: memref<4xi32, #tpu.memory_space<smem>>) -> (i32, i32, i32) {
    %c0_i32 = arith.constant 0 : i32
    %c0_i32_0 = arith.constant 0 : i32
    %c0_i32_1 = arith.constant 0 : i32
    return %arg0, %c0_i32, %c0_i32_0 : i32, i32, i32
  }
  func.func @transform_2(%arg0: i32, %arg1: memref<4xi32, #tpu.memory_space<smem>>) -> (i32, i32, i32) {
    %c0_i32 = arith.constant 0 : i32
    %c0_i32_0 = arith.constant 0 : i32
    %c0_i32_1 = arith.constant 0 : i32
    return %arg0, %c0_i32, %c0_i32_0 : i32, i32, i32
  }
  func.func @transform_3(%arg0: i32, %arg1: memref<4xi32, #tpu.memory_space<smem>>) -> (i32, i32, i32) {
    %c0_i32 = arith.constant 0 : i32
    %c0_i32_0 = arith.constant 0 : i32
    %c0_i32_1 = arith.constant 0 : i32
    %c0_i32_2 = arith.constant 0 : i32
    return %c0_i32, %c0_i32_0, %c0_i32_1 : i32, i32, i32
  }
  func.func @transform_4(%arg0: i32, %arg1: memref<4xi32, #tpu.memory_space<smem>>) -> (i32, i32) {
    %c0_i32 = arith.constant 0 : i32
    %c0_i32_0 = arith.constant 0 : i32
    %c0_i32_1 = arith.constant 0 : i32
    return %c0_i32, %c0_i32_0 : i32, i32
  }
  func.func @transform_5(%arg0: i32, %arg1: memref<4xi32, #tpu.memory_space<smem>>) -> (i32, i32, i32) {
    %c0_i32 = arith.constant 0 : i32
    %c0_i32_0 = arith.constant 0 : i32
    %c0_i32_1 = arith.constant 0 : i32
    return %arg0, %c0_i32, %c0_i32_0 : i32, i32, i32
  }
}

</mosaic_0001>

<bundles_post_ra>
// kernel: tpu_custom_call.1
= control target key start
LH: loop header
LB: loop body
LE: loop exit
PB: predicated region body
PF: predicated region fallthrough
CT: control target
= control target key end

     0   :  { %s2007_s0 = inlined_call_operand.vmem [shape: s32[4], index: 0, kind: input, shape index: {}]   ;;  %s2008_s1 = inlined_call_operand.vmem [shape: bf16[4,16,128], index: 1, kind: input, shape index: {}]   ;;  %s2009_s2 = inlined_call_operand.vmem [shape: bf16[4,16,128], index: 2, kind: input, shape index: {}]   ;;  %s2010_s3 = inlined_call_operand.vmem [shape: s32[4,16,1], index: 3, kind: input, shape index: {}]   ;;  %s2011_s4 = inlined_call_operand.hbm [shape: bf16[4,128,128], index: 4, kind: input, shape index: {}]   ;;  %s2012_s5 = inlined_call_operand.vmem [shape: f32[8,128], index: 5, kind: input, shape index: {}]   ;;  %s2013_s6 = inlined_call_operand.hbm [shape: f32[2,8,128], index: 6, kind: output, shape index: {}]  }
   0x1   :  { %s11_s23 = sshll.u32 %s2007_s0, 4  ;;  %s12_s23 = int_to_ptr.vmem [resolvable:$true] %s11_s23 }
   0x2   :  { %s1563_s24 = scalar_lea.vmem %s12_s23, 16  ;;  %p1568_p1 = scmp.lt.s32.totalorder %s12_s23, %s12_s23 }
   0x3   :  { %p1564_p0 = scmp.ne.s32.totalorder %s12_s23, %s1563_s24  ;;  %p1569_p2 = scmp.lt.s32.totalorder %s1563_s24, %s1563_s24 }
   0x5   :  { %p1570_p3 = por %p1569_p2, %p1568_p1 }
   0x7   :  { %p1571_p4 = pnand %p1570_p3, %p1564_p0 }
   0x9   :  { %1574 = shalt.err (!%p1571_p4)  }
   0xa   :  { %s1673_s25 = smov [#allocation3]  }
   0xb   :  { %14 = dma.vmem_to_smem %s12_s23, 16, %s1673_s25, [#allocation2] }
   0xc   :  { %1647 = dma.done.wait [#allocation2], 16 }
   0xd   :  { %1648 = vsyncadd [#allocation2], 4294967280 }
   0xe   :  { %16 = sfence }
   0xf   :  { %17 = vsyncpa [#allocation5], 0 }
  0x10   :  { %18 = vsyncpa [#allocation6], 0 }
  0x11   :  { %20 = vsyncpa [#allocation6 + $0x1], 0  ;;  %s1720_s26 = smov 0   ;;  %s1722_s27 = smov 0  }
  0x12   :  { %s1724_s0 = smov 0   ;;  %s1726_s28 = smov 0  }
  0x13 LB: > { %s1741_s29 = sadd.s32 4294967295, %s1671_s28   ;;  %s1227_s30 = sadd.s32 4294967294, %s1671_s28   ;;  %s1671_s28 = sphi %s1726_s28, %s2029_s28   ;;  %s1667_s0 = sphi %s1724_s0, %s2028_s0   ;;  %s1663_s27 = sphi %s1722_s27, %s2027_s27   ;;  %s1659_s26 = sphi %s1720_s26, %s2026_s26  }
  0x14   : > { %s1745_s7 = sadd.s32 1, %s1671_s28   ;;  %s153_s8 = sadd.s32 1, %s1667_s0 }
  0x15   : > { %s150_s9 = ssub.s32 %s1671_s28, %s1745_s7  ;;  %p163_p5 = scmp.ne.s32.totalorder %s1667_s0, %s1663_s27 }
  0x16   : > { %p151_p6 = scmp.eq.s32.totalorder %s150_s9, 0  ;;  %p164_p7 = scmp.eq.s32.totalorder %s1741_s29, 1 }
  0x17   : > { %p169_p8 = scmp.ne.s32.totalorder %s1663_s27, %s1659_s26  ;;  %p170_p9 = scmp.eq.s32.totalorder %s1227_s30, 1 }
  0x18   : > { %s1756_s10 = scalar_select %p151_p6, %s1667_s0, %s153_s8  }
  0x19   : > { %p1758_p10 = por %p164_p7, %p163_p5  ;;  %p1762_p11 = por %p170_p9, %p169_p8 }
  0x1a   : > { %p1228_p12 = scmp.ge.s32.totalorder %s1671_s28, 1  ;;  %p177_p13 = scmp.lt.s32.totalorder %s1671_s28, 3 }
  0x1b   : > { %s2017_s11 = scalar_select %p1758_p10, 1, 0 }
  0x1c   : > { %s2018_s12 = scalar_select %p1762_p11, 1, 0 }
  0x1d   : > { %p2014_p0 = scmp.eq.s32.totalorder %s1741_s29, 0  ;;  %p1769_p1 = pnand %p1228_p12, %p177_p13 }
  0x1e   : > { %s1674_s14 = smov [#allocation4]   ;;  %s1575_s19 = scalar_lea.hbm %s2011_s4, 4096 }
  0x1f   : > { %s2019_s13 = scalar_select %p1769_p1, 1, 0 }
  0x20   : > { %s189_s15 = sshll.u32 %s1674_s14, 4  ;;  %p1438_p2 = pneg %p1769_p1  ;;  %s190_s15 = int_to_ptr.vmem [resolvable:$true] %s189_s15 }
  0x21   : > { %p1576_p4 = scmp.ne.s32.totalorder %s2011_s4, %s1575_s19  ;;  %p1582_p8 = scmp.lt.u32.totalorder %s1575_s19, %s2011_s4 }
  0x22   : > { %p1777_p3 = pnand %p2014_p0, %p1438_p2 }
  0x24   : > { %p1577_p5 = pneg %p1777_p3 }
  0x26   : > { %p1578_p6 = pnand %p1577_p5, %p1576_p4 }
  0x28   : > { %p1579_p7 = pneg %p1578_p6 }
  0x2a   : > { %p1584_p9 = pnand %p1582_p8, %p1579_p7 }
  0x2c   : > { %1587 = shalt.err (!%p1584_p9)
}
  0x2d   : > { %s1588_s24 = scalar_lea.vmem %s190_s15, 4096  ;;  %p1596_p0 = scmp.lt.s32.totalorder %s190_s15, %s190_s15 }
  0x2e   : > { %p1589_p12 = scmp.ne.s32.totalorder %s190_s15, %s1588_s24  ;;  %p1597_p11 = scmp.lt.s32.totalorder %s1588_s24, %s1588_s24 }
  0x30   : > { %p1591_p13 = pnand %p1589_p12, %p1577_p5  ;;  %p1598_p10 = por %p1597_p11, %p1596_p0 }
  0x32   : > { %p1592_p2 = pneg %p1591_p13 }
  0x34   : > { %p1599_p1 = pnand %p1598_p10, %p1592_p2 }
  0x36   : > { %1602 = shalt.err (!%p1599_p1)
}
  0x37   : > { %s1675_s25 = smov 64   ;;  %s1676_s30 = smov 4  }
  0x38   : > { %1441 = dma.hbm_to_vmem [thread:$0]  (!%p1777_p3), %s2011_s4, 4096, %s190_s15, [#allocation5], %s1675_s25, %s1675_s25, %s1676_s30  }
  0x39   : > { %p2021_p4 = scmp.ne.s32.totalorder %s2019_s13, 0 }
  0x3a   : > { %p2022_p6 = scmp.eq.s32.totalorder (!%p2021_p4), %s1741_s29, 0 }
  0x3b   : > { %238 = sbr.rel (%p2021_p4) target bundleno = 1365 (0x555), region = 40 }
  0x42   : > { %1650 = dma.done.wait (%p2022_p6), [#allocation5], 4096   ;;  %p2023_p5 = pmov %p2022_p6 }
  0x43   : > { %s1804_s14 = sshll.u32 %s1741_s29, 1  ;;  %v1491_v0 = vld [vmem:[#allocation4] sm:$0xff]   ;;  %v1492_v1 = vld [vmem:[#allocation4 + $0x8] sm:$0xff]   ;;  %v1493_v2 = vld [vmem:[#allocation4 + $0x10] sm:$0xff]   ;;  %v374_v18 = vlaneseq  ;;  %v1677_v37 = vmov 0.0   ;;  %vm1678_vm0 = vmmov 0  }
  0x44   : > { %1652 = vsyncadd (%p2023_p5), [#allocation5], 4294963200  ;;  %p280_p10 = scmp.lt.s32.totalorder %s1804_s14, 3  ;;  %1346 = vmatprep.subr.bf16.mxu0 %v1491_v0  ;;  %v1494_v3 = vld [vmem:[#allocation4 + $0x18] sm:$0xff]   ;;  %v1501_v5 = vld [vmem:[#allocation4 + $0x40] sm:$0xff]   ;;  %v1679_v56 = vmov 0  }
  0x45   : > { %1347 = vmatpush3.bf16.msra.mxu0 %v1491_v0  ;;  %v1502_v6 = vld [vmem:[#allocation4 + $0x48] sm:$0xff]   ;;  %v1495_v7 = vld [vmem:[#allocation4 + $0x20] sm:$0xff]   ;;  %1366 = vmatprep.subr.bf16.mxu1 %v1501_v5  ;;  %v1503_v8 = vld [vmem:[#allocation4 + $0x50] sm:$0xff]   ;;  %v1824_v19 = vshrl.u32 %v374_v18, 7  ;;  %s609_s9 = sadd.s32 1, %s1804_s14  ;;  %vm662_vm5 = vcmask 1041409  }
  0x46   : > { %s1808_s16 = scalar_select %p280_p10, %s1804_s14, 3  ;;  %1348 = vmatprep.subr.bf16.mxu0 %v1492_v1  ;;  %1367 = vmatpush3.bf16.msra.mxu1 %v1501_v5  ;;  %v1496_v9 = vld [vmem:[#allocation4 + $0x28] sm:$0xff]   ;;  %v1497_v10 = vld [vmem:[#allocation4 + $0x30] sm:$0xff]   ;;  %v1498_v11 = vld [vmem:[#allocation4 + $0x38] sm:$0xff]  }
  0x47   : > { %1368 = vmatprep.subr.bf16.mxu1 %v1502_v6  ;;  %v1504_v13 = vld [vmem:[#allocation4 + $0x58] sm:$0xff]   ;;  %v1505_v14 = vld [vmem:[#allocation4 + $0x60] sm:$0xff]   ;;  %v1506_v15 = vld [vmem:[#allocation4 + $0x68] sm:$0xff]   ;;  %v1827_v20 = vsub.s32 0, %v1824_v19  ;;  %1490 = vset.pattern.permute.xlu1 %v1679_v56  ;;  %v600_v59 = vadd.s32 8, %v1824_v19  ;;  %s1301_s19 = sshll.u32 %s1741_s29, 7 }
  0x48   : > { %s1304_s13 = sshll.u32 %s1808_s16, 3  ;;  %v1507_v16 = vld [vmem:[#allocation4 + $0x70] sm:$0xff]   ;;  %v1508_v17 = vld [vmem:[#allocation4 + $0x78] sm:$0xff]   ;;  %v1832_v21 = vld [vmem:[%s2012_s5] sm:$0xff]  ;;  %s1306_s24 = sshll.u32 %s1808_s16, 4  ;;  %1489 = vset.pattern.permute.xlu0 %v1679_v56 }
  0x49   : > { %s284_s18 = scalar_lea.vmem %s2008_s1, %s1304_s13  ;;  %1349 = vmatpush3.bf16.msra.mxu0 %v1492_v1  ;;  %s1821_s21 = scalar_lea.vmem %s2009_s2, %s1304_s13  ;;  %v377_v22 = vrot.slane %v1832_v21, %v1827_v20  ;;  %v1509_v38 = vld [vmem:[#allocation4 + $0x80] sm:$0xff]   ;;  %v1511_v40 = vld [vmem:[#allocation4 + $0x88] sm:$0xff]   ;;  %v1513_v42 = vld [vmem:[#allocation4 + $0x90] sm:$0xff]  }
  0x4a   : > { %1350 = vmatprep.subr.bf16.mxu0 %v1493_v2  ;;  %v1499_v4 = vld [vmem:[%s284_s18] sm:$0xff]   ;;  %1369 = vmatpush3.bf16.msra.mxu1 %v1502_v6  ;;  %v1500_v12 = vld [vmem:[%s284_s18 + $0x8] sm:$0xff]   ;;  %v1514_v43 = vld [vmem:[#allocation4 + $0xd0] sm:$0xff]   ;;  %s1851_s8 = scalar_lea.vmem %s2010_s3, %s1306_s24  ;;  %s610_s16 = sld [smem:[#allocation3 + %s609_s9]]  ;;  %v495_v6 = vsub.s32 1, %v1824_v19 }
  0x4b   : > { %1362 = vmatprep.mubr.bf16.mxu0 %v1499_v4  ;;  %1370 = vmatprep.subr.bf16.mxu1 %v1503_v8  ;;  %v1510_v39 = vld [vmem:[#allocation4 + $0xc0] sm:$0xff]   ;;  %v1512_v41 = vld [vmem:[#allocation4 + $0xc8] sm:$0xff]   ;;  %v1515_v44 = vld [vmem:[#allocation4 + $0x98] sm:$0xff]   ;;  %s601_s13 = sld [smem:[#allocation3 + %s1804_s14]]  ;;  %s276_s14 = sand.u32 1, %s1663_s27  }
  0x4c   : > { %v1516_v45 = vld [vmem:[#allocation4 + $0xd8] sm:$0xff]   ;;  %v1517_v46 = vld [vmem:[#allocation4 + $0xa0] sm:$0xff]   ;;  %v1520_v48 = vld [vmem:[#allocation4 + $0xe8] sm:$0xff]   ;;  %s1233_s15 = sshll.u32 %s276_s14, 3  ;;  %s1965_s25 = scalar_lea.hbm %s2013_s6, %s1301_s19 }
  0x4d   : > { %1351 = vmatpush3.bf16.msra.mxu0 %v1493_v2  ;;  %v1518_v47 = vld [vmem:[#allocation4 + $0xe0] sm:$0xff]   ;;  %v1519_v49 = vld [vmem:[#allocation4 + $0xa8] sm:$0xff]   ;;  %v1522_v50 = vld [vmem:[#allocation4 + $0xf0] sm:$0xff]   ;;  %s278_s20 = scalar_lea.vmem [#allocation7], %s1233_s15  ;;  %s1119_s29 = scalar_lea.sflag [#allocation6], %s276_s14 }
  0x4e   : > { %1352 = vmatprep.subr.bf16.mxu0 %v1494_v3  ;;  %1371 = vmatpush3.bf16.msra.mxu1 %v1503_v8  ;;  %v1521_v51 = vld [vmem:[#allocation4 + $0xb0] sm:$0xff]   ;;  %v1524_v52 = vld [vmem:[#allocation4 + $0xf8] sm:$0xff]   ;;  %v1525_v54 = vld [vmem:[%s1821_s21] sm:$0xff]   ;;  %p2024_p0 = scmp.ne.s32.totalorder %s2017_s11, 0 }
  0x4f   : > { %1372 = vmatprep.subr.bf16.mxu1 %v1504_v13  ;;  %v1523_v53 = vld [vmem:[#allocation4 + $0xb8] sm:$0xff]   ;;  %v1526_v55 = vld [vmem:[%s1821_s21 + $0x8] sm:$0xff]   ;;  %v1858_v58 = vld [vmem:[%s1851_s8 + $0x10] sm:$0xff]  ;;  %s1132_s21 = sshll.u32 %s278_s20, 4  ;;  %s1967_s21 = int_to_ptr.vmem [resolvable:$true] %s1132_s21 }
  0x50   : > { %v1854_v57 = vld [vmem:[%s1851_s8 + $0x8] sm:$0xff]  ;;  %v611_v60 = vstv %s610_s16  ;;  %s1603_s30 = scalar_lea.vmem %s1967_s21, 128 }
  0x51   : > { %1353 = vmatpush3.bf16.msra.mxu0 %v1494_v3  ;;  %939 = vperm.xlu1 %1490, %v1854_v57   ;;  %v602_v61 = vstv %s601_s13  ;;  %vm612_vm1 = vcmp.lt.s32.totalorder %v1824_v19, %v611_v60  ;;  %vm613_vm2 = vcmp.lt.s32.totalorder %v600_v59, %v611_v60  ;;  %vm924_vm15 = vcmp.ge.s32.totalorder %v1854_v57, 0  ;;  %p1604_p11 = scmp.ne.s32.totalorder %s1967_s21, %s1603_s30 }
  0x52   : > { %1354 = vmatprep.subr.bf16.mxu0 %v1495_v7  ;;  %1373 = vmatpush3.bf16.msra.mxu1 %v1504_v13  ;;  %vm603_vm3 = vcmp.lt.s32.totalorder %v1824_v19, %v602_v61  ;;  %vm604_vm4 = vcmp.lt.s32.totalorder %v600_v59, %v602_v61  ;;  %v1264_v62 = vsel %vm612_vm1, 1.0, %v1677_v37  ;;  %v1265_v63 = vsel %vm613_vm2, 1.0, %v1677_v37 }
  0x53   : > { %1374 = vmatprep.subr.bf16.mxu1 %v1505_v14  ;;  %v1262_v0 = vsel %vm603_vm3, 1.0, %v1677_v37  ;;  %v1263_v1 = vsel %vm604_vm4, 1.0, %v1677_v37  ;;  %v625_v2 = vadd.f32 %v1265_v63, %v1264_v62  ;;  %vm1059_vm1 = vcmask 7168   ;;  %p1605_p1 = pnand %p1604_p11, %p2024_p0 }
  0x54   : > { %v618_v3 = vadd.f32 %v1263_v1, %v1262_v0  ;;  %vm925_vm2 = vcmp.ge.s32.totalorder %v1858_v58, 0 }
  0x55   : > { %1355 = vmatpush3.bf16.msra.mxu0 %v1495_v7  ;;  %942 = vperm.xlu1 %1490, %v1858_v58   ;;  %v626_v4 = vrot.slane %v625_v2, 4  ;;  %p1606_p3 = pneg %p1605_p1 }
  0x56   : > { %1356 = vmatprep.subr.bf16.mxu0 %v1496_v9  ;;  %1375 = vmatpush3.bf16.msra.mxu1 %v1505_v14  ;;  %v619_v5 = vrot.slane %v618_v3, 4 }
  0x57   : > { %1376 = vmatprep.subr.bf16.mxu1 %v1506_v15  ;;  %v627_v7 = vadd.f32 %v626_v4, %v625_v2 }
  0x58   : > { %v620_v8 = vadd.f32 %v619_v5, %v618_v3 }
  0x59   : > { %1357 = vmatpush3.bf16.msra.mxu0 %v1496_v9  ;;  %v496_v9 = vrot.slane %v1832_v21, %v495_v6 }
  0x5a   : > { %1358 = vmatprep.subr.bf16.mxu0 %v1497_v10  ;;  %1377 = vmatpush3.bf16.msra.mxu1 %v1506_v15 }
  0x5b   : > { %1378 = vmatprep.subr.bf16.mxu1 %v1507_v16 }
  0x5d   : > { %1359 = vmatpush3.bf16.msra.mxu0 %v1497_v10  ;;  %v628_v10 = vrot.slane %v627_v7, 2 }
  0x5e   : > { %1360 = vmatprep.subr.bf16.mxu0 %v1498_v11  ;;  %1379 = vmatpush3.bf16.msra.mxu1 %v1507_v16 }
  0x5f   : > { %1380 = vmatprep.subr.bf16.mxu1 %v1508_v17 }
  0x61   : > { %1361 = vmatpush3.bf16.msra.mxu0 %v1498_v11 }
  0x62   : > { %1381 = vmatpush3.bf16.msra.mxu1 %v1508_v17  ;;  %1386 = vmatprep.subr.bf16.mxu0 %v1677_v37 }
  0x63   : > { %1406 = vmatprep.subr.bf16.mxu1 %v1510_v39 }
  0x64   : > { %1363 = vmatmul.mubr.bf16.vlgmr.msra.gmra.mrb[0].mxu0 %v1500_v12  ;;  %v621_v12 = vrot.slane %v620_v8, 2 }
  0x65   : > { %1387 = vmatpush3.bf16.msra.mxu0 %v1509_v38  ;;  %1402 = vmatprep.mubr.msk.bf16.mxu0 %vm1678_vm0, %v1677_v37 }
  0x66   : > { %1388 = vmatprep.subr.bf16.mxu0 %v1677_v37 }
  0x69   : > { %1389 = vmatpush3.bf16.msra.mxu0 %v1511_v40 }
  0x6a   : > { %1390 = vmatprep.subr.bf16.mxu0 %v1677_v37 }
  0x6d   : > { %1391 = vmatpush3.bf16.msra.mxu0 %v1513_v42 }
  0x6e   : > { %1392 = vmatprep.subr.bf16.mxu0 %v1677_v37 }
  0x71   : > { %1393 = vmatpush3.bf16.msra.mxu0 %v1515_v44 }
  0x72   : > { %1394 = vmatprep.subr.bf16.mxu0 %v1677_v37 }
  0x75   : > { %1395 = vmatpush3.bf16.msra.mxu0 %v1517_v46 }
  0x76   : > { %1396 = vmatprep.subr.bf16.mxu0 %v1677_v37 }
  0x79   : > { %1397 = vmatpush3.bf16.msra.mxu0 %v1519_v49 }
  0x7a   : > { %1398 = vmatprep.subr.bf16.mxu0 %v1677_v37 }
  0x7d   : > { %1399 = vmatpush3.bf16.msra.mxu0 %v1521_v51 }
  0x7e   : > { %1400 = vmatprep.subr.bf16.mxu0 %v1677_v37 }
  0x81   : > { %1401 = vmatpush3.bf16.msra.mxu0 %v1523_v53 }
 0x137   : > { %v1364_v23 = vpop.f32.mrb[0].mxu0 }
 0x138   : > { %v481_v24 = vadd.f32 %v1364_v23, %v377_v22  ;;  %v472_v25 = vpop.f32.mrb[1].mxu0 }
 0x139   : > { %v473_v26 = vadd.f32 %v472_v25, %v377_v22  ;;  %v1365_v27 = vpop.f32.mrb[2].mxu0  ;;  %v622_v25 = vadd.f32 %v621_v12, %v620_v8 }
 0x13a   : > { %1527 = vtanh.f32 %v481_v24  ;;  %v484_v28 = vadd.f32 %v1365_v27, %v377_v22  ;;  %v475_v29 = vpop.f32.mrb[3].mxu0 }
 0x13b   : > { %1529 = vtanh.f32 %v473_v26  ;;  %v476_v30 = vadd.f32 %v475_v29, %v377_v22  ;;  %v629_v22 = vadd.f32 %v628_v10, %v627_v7  ;;  %v623_v27 = vrot.slane %v622_v25, 1 }
 0x13c   : > { %1531 = vtanh.f32 %v484_v28  ;;  %v1680_v7 = vmov 1966171168  }
 0x13d   : > { %1533 = vtanh.f32 %v476_v30  ;;  %v630_v26 = vrot.slane %v629_v22, 1  ;;  %v624_v29 = vadd.f32 %v623_v27, %v622_v25  ;;  %v869_v8 = vunpack.c.l.s4 %v1680_v7 }
 0x13f   : > { %v631_v28 = vadd.f32 %v630_v26, %v629_v22 }
 0x144   : > { %v1528_v31 = vpop.eup %1527 }
 0x145   : > { %v1530_v32 = vpop.eup %1529 }
 0x146   : > { %v1532_v33 = vpop.eup %1531 }
 0x147   : > { %v1534_v34 = vpop.eup %1533  ;;  %v492_v35 = vpack.c.bf16 %v1532_v33, %v1528_v31 }
 0x148   : > { %v491_v36 = vpack.c.bf16 %v1534_v34, %v1530_v32 }
 0x14a   : > { %1382 = vmatprep.mubr.bf16.mxu1 %v491_v36 }
 0x14b   : > { %1383 = vmatmul.mubr.bf16.vlgmr.msra.gmra.mrb[0].mxu1 %v492_v35  ;;  %v633_v35 = vmax.f32 %v631_v28, 1.0 }
 0x14c   : > { %1407 = vmatpush3.bf16.msra.mxu1 %v1510_v39  ;;  %1422 = vmatprep.mubr.bf16.mxu1 %v1525_v54  ;;  %v632_v39 = vmax.f32 %v624_v29, 1.0 }
 0x14d   : > { %1408 = vmatprep.subr.bf16.mxu1 %v1512_v41 }
 0x150   : > { %1409 = vmatpush3.bf16.msra.mxu1 %v1512_v41 }
 0x151   : > { %1410 = vmatprep.subr.bf16.mxu1 %v1514_v43 }
 0x154   : > { %1411 = vmatpush3.bf16.msra.mxu1 %v1514_v43 }
 0x155   : > { %1412 = vmatprep.subr.bf16.mxu1 %v1516_v45 }
 0x158   : > { %1413 = vmatpush3.bf16.msra.mxu1 %v1516_v45 }
 0x159   : > { %1414 = vmatprep.subr.bf16.mxu1 %v1518_v47 }
 0x15c   : > { %1415 = vmatpush3.bf16.msra.mxu1 %v1518_v47 }
 0x15d   : > { %1416 = vmatprep.subr.bf16.mxu1 %v1520_v48 }
 0x160   : > { %1417 = vmatpush3.bf16.msra.mxu1 %v1520_v48 }
 0x161   : > { %1418 = vmatprep.subr.bf16.mxu1 %v1522_v50 }
 0x164   : > { %1419 = vmatpush3.bf16.msra.mxu1 %v1522_v50 }
 0x165   : > { %1420 = vmatprep.subr.bf16.mxu1 %v1524_v52 }
 0x168   : > { %1421 = vmatpush3.bf16.msra.mxu1 %v1524_v52 }
 0x16b   : > { %1423 = vmatmul.mubr.bf16.vlgmr.msra.gmra.mrb[4].mxu1 %v1526_v55 }
 0x21e   : > { %v1384_v11 = vpop.f32.mrb[0].mxu1 }
 0x21f   : > { %v588_v13 = vadd.f32 %v1384_v11, %v496_v9  ;;  %v579_v14 = vpop.f32.mrb[1].mxu1 }
 0x220   : > { %v580_v15 = vadd.f32 %v579_v14, %v496_v9  ;;  %v1385_v16 = vpop.f32.mrb[2].mxu1  ;;  %v906_v14 = vsub.s32 2, %v1824_v19 }
 0x221   : > { %1535 = vtanh.f32 %v588_v13  ;;  %v591_v17 = vadd.f32 %v1385_v16, %v496_v9  ;;  %v582_v23 = vpop.f32.mrb[3].mxu1 }
 0x222   : > { %1537 = vtanh.f32 %v580_v15  ;;  %v583_v24 = vadd.f32 %v582_v23, %v496_v9  ;;  %v870_v9 = vunpack.c.0.s8 %v869_v8  ;;  %v1875_v23 = vand.u32 127, %v374_v18 }
 0x223   : > { %1539 = vtanh.f32 %v591_v17  ;;  %v907_v25 = vrot.slane %v1832_v21, %v906_v14 }
 0x224   : > { %1541 = vtanh.f32 %v583_v24  ;;  %v873_v10 = vsub.s32 %v870_v9, %v1824_v19  ;;  %vm914_vm6 = vcmp.lt.s32.totalorder %v1875_v23, 16 }
 0x225   : > { %1543 = vrcp.f32 %v633_v35 }
 0x226   : > { %1545 = vrcp.f32 %v632_v39  ;;  %v940_v39 = vpop.permute.xlu1 %939 }
 0x227   : > { %vm948_vm10 = vcmp.eq.s32.totalorder %v1875_v23, %v940_v39 }
 0x22b   : > { %v1536_v30 = vpop.eup %1535 }
 0x22c   : > { %v1538_v31 = vpop.eup %1537  ;;  %v636_v32 = vmul.f32 %v1536_v30, %v1264_v62 }
 0x22d   : > { %v1540_v33 = vpop.eup %1539  ;;  %v634_v34 = vmul.f32 %v1538_v31, %v1262_v0 }
 0x22e   : > { %v1542_v36 = vpop.eup %1541  ;;  %v637_v38 = vmul.f32 %v1540_v33, %v1265_v63 }
 0x22f   : > { %v635_v40 = vmul.f32 %v1542_v36, %v1263_v1  ;;  %v1544_v52 = vpop.eup %1543  ;;  %v1888_v36 = vld [vmem:[%s1851_s8 + $0x18] sm:$0xff] }
 0x230   : > { %v645_v41 = vadd.f32 %v637_v38, %v636_v32  ;;  %v1546_v54 = vpop.eup %1545  ;;  %v1892_v38 = vld [vmem:[%s1851_s8] sm:$0xff]  ;;  %s1681_s8 = smov [#allocation7]  }
 0x231   : > { %v638_v42 = vadd.f32 %v635_v40, %v634_v34  ;;  %v943_v40 = vpop.permute.xlu1 %942  ;;  %vm923_vm0 = vcmp.ge.s32.totalorder %v1892_v38, 0  ;;  %s1607_s9 = sshll.u32 %s1681_s8, 4  ;;  %s1608_s9 = int_to_ptr.vmem [resolvable:$false] %s1607_s9 }
 0x232   : > { %v646_v43 = vrot.slane %v645_v41, 4  ;;  %vm949_vm9 = vcmp.eq.s32.totalorder %v1875_v23, %v943_v40  ;;  %v1284_v14 = vsel %vm923_vm0, 1.0, %v1677_v37  ;;  %s1609_s16 = scalar_lea.vmem %s1608_s9, 256  ;;  %p1610_p7 = scmp.lt.s32.totalorder %s1967_s21, %s1608_s9 }
 0x233   : > { %v639_v44 = vrot.slane %v638_v42, 4  ;;  %p1611_p8 = scmp.lt.s32.totalorder %s1609_s16, %s1603_s30 }
 0x234   : > { %v647_v45 = vadd.f32 %v646_v43, %v645_v41 }
 0x235   : > { %v640_v46 = vadd.f32 %v639_v44, %v638_v42  ;;  %p1612_p9 = por %p1611_p8, %p1610_p7 }
 0x236   : > { %v648_v47 = vrot.slane %v647_v45, 2 }
 0x237   : > { %v641_v48 = vrot.slane %v640_v46, 2  ;;  %p1613_p12 = pnand %p1612_p9, %p1606_p3 }
 0x238   : > { %v649_v49 = vadd.f32 %v648_v47, %v647_v45 }
 0x239   : > { %v642_v50 = vadd.f32 %v641_v48, %v640_v46 }
 0x23a   : > { %v650_v51 = vrot.slane %v649_v49, 1 }
 0x23b   : > { %v643_v53 = vrot.slane %v642_v50, 1 }
 0x23c   : > { %v651_v55 = vadd.f32 %v650_v51, %v649_v49 }
 0x23d   : > { %v644_v56 = vadd.f32 %v643_v53, %v642_v50 }
 0x23e   : > { %v655_v59 = vmul.f32 %v1544_v52, %v651_v55  ;;  %v1424_v3 = vpop.f32.mrb[4].mxu1 }
 0x23f   : > { %v653_v60 = vmul.f32 %v1546_v54, %v644_v56  ;;  %v852_v4 = vpop.f32.mrb[5].mxu1 }
 0x240   : > { %v657_v61 = vpack.c.bf16 %v655_v59, %v655_v59  ;;  %v1425_v5 = vpop.f32.mrb[6].mxu1 }
 0x241   : > { %v656_v62 = vpack.c.bf16 %v653_v60, %v653_v60  ;;  %v855_v6 = vpop.f32.mrb[7].mxu1 }
 0x242   : > { %v661_v63 = vunpack.c.l.b16 %v657_v61 }
 0x243   : > { %v660_v0 = vunpack.c.l.b16 %v656_v62 }
 0x245   : > { %v663_v1 = vsel %vm662_vm5, %v661_v63, %v660_v0  ;;  %v1290_v0 = vsel %vm949_vm9, 1.0, %v1677_v37  ;;  %vm926_vm5 = vcmp.ge.s32.totalorder %v1888_v36, 0  ;;  %vm1113_vm9 = vcmask 1041408  }
 0x246   : > { %v664_v2 = vpack.c.b16 %v663_v1, %v663_v1 }
 0x248   : > { %1403 = vmatmul.mubr.bf16.vlgmr.msra.gmra.mrb[4].mxu0 %v664_v2 }
 0x31b   : > { %v748_v11 = vpop.f32.mrb[4].mxu0 }
 0x31c   : > { %v874_v12 = vrot.slane %v748_v11, %v873_v10  ;;  %v1404_v13 = vpop.f32.mrb[5].mxu0 }
 0x31d   : > { %v751_v15 = vpop.f32.mrb[6].mxu0  ;;  %v1285_v13 = vsel %vm924_vm15, 1.0, %v1677_v37 }
 0x31e   : > { %v875_v16 = vcombine.high %v874_v12, %v874_v12  ;;  %v882_v17 = vrot.slane %v874_v12, %v873_v10  ;;  %v1405_v22 = vpop.f32.mrb[7].mxu0  ;;  %v1093_v15 = vsel %vm1059_vm1, %v1285_v13, 0.0 }
 0x320   : > { %v889_v24 = vrot.slane %v875_v16, %v873_v10  ;;  %v893_v26 = vrot.slane %v882_v17, %v1827_v20  ;;  %v1092_v16 = vsel %vm1059_vm1, %v1284_v14, 0.0  ;;  %v1286_v17 = vsel %vm925_vm2, 1.0, %v1677_v37 }
 0x321   : > { %v1094_v22 = vadd.f32 %v1093_v15, %v1092_v16 }
 0x322   : > { %v897_v27 = vrot.slane %v889_v24, %v1827_v20  ;;  %v900_v28 = vadd.f32 %v893_v26, %v852_v4  ;;  %v901_v29 = vadd.f32 %v893_v26, %v855_v6 }
 0x324   : > { %v902_v19 = vadd.f32 %v1424_v3, %v897_v27  ;;  %v908_v30 = vadd.f32 %v907_v25, %v900_v28  ;;  %v903_v31 = vadd.f32 %v1425_v5, %v897_v27  ;;  %v909_v33 = vadd.f32 %v907_v25, %v901_v29 }
 0x325   : > { %v1289_v3 = vsel %vm948_vm10, 1.0, %v1677_v37  ;;  %vm1115_vm10 = vcmask 1042432  }
 0x326   : > { %v910_v32 = vadd.f32 %v907_v25, %v902_v19  ;;  %v915_v18 = vsel %vm914_vm6, %v908_v30, -1e+30  ;;  %v911_v34 = vadd.f32 %v907_v25, %v903_v31  ;;  %v916_v21 = vsel %vm914_vm6, %v909_v33, -1e+30 }
 0x327   : > { %959 = vmax.xlane.f32.xlu0 %v915_v18  ;;  %v1000_v5 = vmul.f32 %v1289_v3, %v916_v21 }
 0x328   : > { %v1881_v35 = vsel %vm914_vm6, %v910_v32, -1e+30  ;;  %v1884_v20 = vsel %vm914_vm6, %v911_v34, -1e+30 }
 0x329   : > { %963 = vmax.xlane.f32.xlu1 %v1881_v35  ;;  %v1001_v1 = vmul.f32 %v1290_v0, %v1881_v35 }
 0x32b   : > { %961 = vmax.xlane.f32.xlu0 %v916_v21 }
 0x32d   : > { %965 = vmax.xlane.f32.xlu1 %v1884_v20 }
 0x33e   : > { %945 = vperm.xlu1 %1490, %v1888_v36  }
 0x341   : > { %936 = vperm.xlu0 %1489, %v1892_v38  }
 0x3b4   : > { %v1895_v41 = vpop.xlane.xlu0 %959 }
 0x3b5   : > { %v967_v42 = vsub.f32 %v915_v18, %v1895_v41  ;;  %vm1019_vm8 = vcmp.ge.f32.partialorder %v915_v18, %v1895_v41 }
 0x3b6   : > { %v1898_v43 = vpop.xlane.xlu1 %963  ;;  %v1292_v61 = vsel %vm1019_vm8, 1.0, %v1677_v37  ;;  %vm1111_vm8 = vcmask 1040384  }
 0x3b7   : > { %v971_v44 = vmul.f32 1.442695, %v967_v42  ;;  %v969_v46 = vsub.f32 %v1881_v35, %v1898_v43  ;;  %vm1021_vm13 = vcmp.ge.f32.partialorder %v1881_v35, %v1898_v43 }
 0x3b8   : > { %v1900_v45 = vpop.xlane.xlu0 %961  ;;  %v1294_v9 = vsel %vm1021_vm13, 1.0, %v1677_v37 }
 0x3b9   : > { %1547 = vpow2.f32 %v971_v44  ;;  %v968_v47 = vsub.f32 %v916_v21, %v1900_v45  ;;  %v975_v50 = vmul.f32 1.442695, %v969_v46  ;;  %vm1020_vm12 = vcmp.ge.f32.partialorder %v916_v21, %v1900_v45 }
 0x3ba   : > { %v1905_v48 = vpop.xlane.xlu1 %965  ;;  %v1293_v7 = vsel %vm1020_vm12, 1.0, %v1677_v37  ;;  %v1033_v10 = vmul.f32 %v1294_v9, %v1290_v0 }
 0x3bb   : > { %v973_v49 = vmul.f32 1.442695, %v968_v47  ;;  %v970_v51 = vsub.f32 %v1884_v20, %v1905_v48  ;;  %v1032_v8 = vmul.f32 %v1293_v7, %v1289_v3  ;;  %vm1022_vm14 = vcmp.ge.f32.partialorder %v1884_v20, %v1905_v48 }
 0x3bc   : > { %v1295_v11 = vsel %vm1022_vm14, 1.0, %v1677_v37 }
 0x3bd   : > { %1549 = vpow2.f32 %v973_v49  ;;  %v977_v53 = vmul.f32 1.442695, %v970_v51 }
 0x3be   : > { %1551 = vpow2.f32 %v975_v50  ;;  %v946_v60 = vpop.permute.xlu1 %945 }
 0x3bf   : > { %1553 = vpow2.f32 %v977_v53  ;;  %vm950_vm11 = vcmp.eq.s32.totalorder %v1875_v23, %v946_v60  ;;  %v1287_v60 = vsel %vm926_vm5, 1.0, %v1677_v37 }
 0x3c0   : > { %v937_v52 = vpop.permute.xlu0 %936  ;;  %v1291_v4 = vsel %vm950_vm11, 1.0, %v1677_v37 }
 0x3c1   : > { %vm947_vm7 = vcmp.eq.s32.totalorder %v1875_v23, %v937_v52  ;;  %v1002_v6 = vmul.f32 %v1291_v4, %v1884_v20  ;;  %v1034_v12 = vmul.f32 %v1295_v11, %v1291_v4  ;;  %v1095_v23 = vsel %vm1059_vm1, %v1286_v17, 0.0 }
 0x3c2   : > { %v1288_v55 = vsel %vm947_vm7, 1.0, %v1677_v37  ;;  %v1938_v24 = vadd.f32 %v1095_v23, %v1094_v22 }
 0x3c3   : > { %v1548_v54 = vpop.eup %1547  ;;  %v999_v56 = vmul.f32 %v1288_v55, %v915_v18  ;;  %v1031_v62 = vmul.f32 %v1292_v61, %v1288_v55 }
 0x3c4   : > { %979 = vadd.xlane.f32.xlu1 %v1548_v54 }
 0x3c7   : > { %v1550_v59 = vpop.eup %1549 }
 0x3c8   : > { %981 = vadd.xlane.f32.xlu0 %v1550_v59  ;;  %1003 = vadd.xlane.f32.xlu1 %v999_v56  ;;  %v1552_v63 = vpop.eup %1551 }
 0x3c9   : > { %v1554_v2 = vpop.eup %1553 }
 0x3cc   : > { %1035 = vadd.xlane.f32.xlu0 %v1031_v62  ;;  %983 = vadd.xlane.f32.xlu1 %v1552_v63 }
 0x3d0   : > { %985 = vadd.xlane.f32.xlu1 %v1554_v2  ;;  %1007 = vadd.xlane.f32.xlu0 %v1001_v1 }
 0x3d4   : > { %1005 = vadd.xlane.f32.xlu1 %v1000_v5  ;;  %1009 = vadd.xlane.f32.xlu0 %v1002_v6 }
 0x3d8   : > { %1037 = vadd.xlane.f32.xlu1 %v1032_v8 }
 0x3dc   : > { %1039 = vadd.xlane.f32.xlu1 %v1033_v10  ;;  %v1097_v10 = vsel %vm1059_vm1, %v1287_v60, 0.0 }
 0x3e0   : > { %1041 = vadd.xlane.f32.xlu1 %v1034_v12 }
 0x451   : > { %v980_v57 = vpop.xlane.xlu1 %979 }
 0x452   : > { %1555 = vlog2.f32 %v980_v57 }
 0x455   : > { %v982_v25 = vpop.xlane.xlu0 %981  ;;  %v1004_v26 = vpop.xlane.xlu1 %1003 }
 0x456   : > { %1557 = vlog2.f32 %v982_v25 }
 0x459   : > { %v984_v27 = vpop.xlane.xlu1 %983  ;;  %v1036_v30 = vpop.xlane.xlu0 %1035 }
 0x45a   : > { %1559 = vlog2.f32 %v984_v27  ;;  %vm1043_vm3 = vcmp.gt.f32.partialorder %v1036_v30, 0.0 }
 0x45b   : > { %v1296_v21 = vsel %vm1043_vm3, 1.0, %v1677_v37 }
 0x45c   : > { %v1556_v28 = vpop.eup %1555  ;;  %v1055_v49 = vmul.f32 %v1296_v21, %v1284_v14 }
 0x45d   : > { %v988_v29 = vmul.f32 0.6931472, %v1556_v28  ;;  %v986_v19 = vpop.xlane.xlu1 %985  ;;  %v1008_v40 = vpop.xlane.xlu0 %1007 }
 0x45e   : > { %1561 = vlog2.f32 %v986_v19  ;;  %v1076_v61 = vsel %vm1059_vm1, %v1055_v49, 0.0 }
 0x45f   : > { %v995_v58 = vadd.f32 %v988_v29, %v1895_v41 }
 0x460   : > { %v1558_v31 = vpop.eup %1557 }
 0x461   : > { %v990_v32 = vmul.f32 0.6931472, %v1558_v31  ;;  %v1006_v33 = vpop.xlane.xlu1 %1005  ;;  %v1011_v18 = vsub.f32 %v995_v58, %v1004_v26  ;;  %v1010_v36 = vpop.xlane.xlu0 %1009 }
 0x463   : > { %v996_v34 = vadd.f32 %v990_v32, %v1900_v45  ;;  %v1015_v42 = vmul.f32 %v1284_v14, %v1011_v18  ;;  %v1098_v14 = vadd.f32 %v1097_v10, %v1938_v24 }
 0x464   : > { %v1560_v35 = vpop.eup %1559 }
 0x465   : > { %v992_v20 = vmul.f32 0.6931472, %v1560_v35  ;;  %v1012_v38 = vsub.f32 %v996_v34, %v1006_v33  ;;  %v1038_v39 = vpop.xlane.xlu1 %1037  ;;  %v1060_v55 = vsel %vm1059_vm1, %v1015_v42, 0.0 }
 0x466   : > { %vm1044_vm4 = vcmp.gt.f32.partialorder %v1038_v39, 0.0 }
 0x467   : > { %v997_v44 = vadd.f32 %v992_v20, %v1898_v43  ;;  %v1016_v41 = vmul.f32 %v1285_v13, %v1012_v38  ;;  %v1297_v46 = vsel %vm1044_vm4, 1.0, %v1677_v37 }
 0x468   : > { %v1562_v47 = vpop.eup %1561  ;;  %v1056_v50 = vmul.f32 %v1297_v46, %v1285_v13 }
 0x469   : > { %v994_v45 = vmul.f32 0.6931472, %v1562_v47  ;;  %v1013_v51 = vsub.f32 %v997_v44, %v1008_v40  ;;  %v1061_v52 = vsel %vm1059_vm1, %v1016_v41, 0.0  ;;  %v1040_v53 = vpop.xlane.xlu1 %1039 }
 0x46a   : > { %v1077_v54 = vsel %vm1059_vm1, %v1056_v50, 0.0  ;;  %vm1045_vm6 = vcmp.gt.f32.partialorder %v1040_v53, 0.0  ;;  %v1062_v63 = vadd.f32 %v1061_v52, %v1060_v55 }
 0x46b   : > { %v1017_v56 = vmul.f32 %v1286_v17, %v1013_v51  ;;  %v998_v43 = vadd.f32 %v994_v45, %v1905_v48  ;;  %v1298_v59 = vsel %vm1045_vm6, 1.0, %v1677_v37  ;;  %v1078_v3 = vadd.f32 %v1077_v54, %v1076_v61 }
 0x46c   : > { %v1057_v62 = vmul.f32 %v1298_v59, %v1286_v17 }
 0x46d   : > { %v1014_v0 = vsub.f32 %v998_v43, %v1010_v36  ;;  %v1042_v1 = vpop.xlane.xlu1 %1041  ;;  %v1063_v2 = vsel %vm1059_vm1, %v1017_v56, 0.0 }
 0x46e   : > { %vm1046_vm7 = vcmp.gt.f32.partialorder %v1042_v1, 0.0  ;;  %v1064_v4 = vadd.f32 %v1063_v2, %v1062_v63  ;;  %v1079_v5 = vsel %vm1059_vm1, %v1057_v62, 0.0 }
 0x46f   : > { %v1018_v6 = vmul.f32 %v1287_v60, %v1014_v0  ;;  %v1299_v48 = vsel %vm1046_vm7, 1.0, %v1677_v37  ;;  %v1080_v7 = vadd.f32 %v1079_v5, %v1078_v3 }
 0x470   : > { %v1058_v8 = vmul.f32 %v1299_v48, %v1287_v60 }
 0x471   : > { %v1065_v9 = vsel %vm1059_vm1, %v1018_v6, 0.0 }
 0x472   : > { %v1066_v11 = vadd.f32 %v1065_v9, %v1064_v4  ;;  %v1081_v12 = vsel %vm1059_vm1, %v1058_v8, 0.0 }
 0x473   : > { %v1082_v13 = vadd.f32 %v1081_v12, %v1080_v7 }
 0x474   : > { %1067 = vadd.xlane.f32.xlu0 %v1066_v11 }
 0x475   : > { %1083 = vadd.xlane.f32.xlu1 %v1082_v13 }
 0x478   : > { %1099 = vadd.xlane.f32.xlu0 %v1098_v14 }
 0x501   : > { %v1068_v15 = vpop.xlane.xlu0 %1067 }
 0x502   : > { %v1069_v16 = vrot.slane %v1068_v15, 4  ;;  %v1084_v17 = vpop.xlane.xlu1 %1083 }
 0x503   : > { %v1085_v22 = vrot.slane %v1084_v17, 4 }
 0x504   : > { %v1070_v37 = vadd.f32 %v1069_v16, %v1068_v15 }
 0x505   : > { %v1086_v23 = vadd.f32 %v1085_v22, %v1084_v17  ;;  %v1100_v57 = vpop.xlane.xlu0 %1099 }
 0x506   : > { %v1071_v25 = vrot.slane %v1070_v37, 2  ;;  %v1101_v26 = vrot.slane %v1100_v57, 4 }
 0x507   : > { %v1087_v27 = vrot.slane %v1086_v23, 2 }
 0x508   : > { %v1102_v28 = vadd.f32 %v1101_v26, %v1100_v57  ;;  %v1072_v29 = vadd.f32 %v1071_v25, %v1070_v37 }
 0x509   : > { %v1088_v19 = vadd.f32 %v1087_v27, %v1086_v23 }
 0x50a   : > { %v1103_v58 = vrot.slane %v1102_v28, 2  ;;  %v1073_v30 = vrot.slane %v1072_v29, 1 }
 0x50b   : > { %v1089_v31 = vrot.slane %v1088_v19, 1 }
 0x50c   : > { %v1104_v24 = vadd.f32 %v1103_v58, %v1102_v28  ;;  %v1074_v32 = vadd.f32 %v1073_v30, %v1072_v29 }
 0x50d   : > { %v1090_v33 = vadd.f32 %v1089_v31, %v1088_v19 }
 0x50e   : > { %1426 = vpush %v1074_v32  ;;  %v1105_v18 = vrot.slane %v1104_v24, 1 }
 0x50f   : > { %1428 = vpush %v1090_v33 }
 0x510   : > { %v1106_v34 = vadd.f32 %v1105_v18, %v1104_v24 }
 0x512   : > { %1430 = vpush %v1106_v34 }
 0x53f   : > { %s1427_s17 = spop %1426 }
 0x540   : > { %s1429_s18 = spop %1428  ;;  %v1108_v35 = vstv %s1427_s17 }
 0x541   : > { %v1109_v21 = vstv %s1429_s18 }
 0x542   : > { %v1112_v20 = vsel %vm1111_vm8, %v1108_v35, %v1109_v21 }
 0x543   : > { %s1431_s22 = spop %1430 }
 0x544   : > { %v1110_v38 = vstv %s1431_s22 }
 0x545   : > { %v1114_v39 = vsel %vm1113_vm9, %v1112_v20, %v1110_v38 }
 0x546   : > { %v1116_v40 = vsel %vm1115_vm10, %v1114_v39, 0.0 }
 0x547   : > { %1117 = vst [vmem:[%s278_s20] sm:$0xff] %v1116_v40 }
 0x548   : > { %1616 = shalt.err (!%p1613_p12)
}
 0x549   : > { %s1617_s13 = scalar_lea.hbm %s1965_s25, 128  ;;  %s1621_s17 = scalar_lea.hbm %s2013_s6, 256 }
 0x54a   : > { %p1618_p13 = scmp.ne.s32.totalorder %s1965_s25, %s1617_s13  ;;  %p1622_p6 = scmp.lt.u32.totalorder %s1965_s25, %s2013_s6 }
 0x54b   : > { %p1623_p5 = scmp.lt.u32.totalorder %s1621_s17, %s1617_s13  ;;  %p1625_p11 = scmp.lt.u32.totalorder %s1617_s13, %s1965_s25 }
 0x54c   : > { %p1619_p2 = pnand %p1618_p13, %p2024_p0 }
 0x54d   : > { %p1624_p10 = por %p1623_p5, %p1622_p6 }
 0x54e   : > { %p1620_p4 = pneg %p1619_p2 }
 0x54f   : > { %p1626_p1 = por %p1625_p11, %p1624_p10 }
 0x551   : > { %p1627_p3 = pnand %p1626_p1, %p1620_p4 }
 0x553   : > { %1630 = shalt.err (!%p1627_p3)
}
 0x554   : > { %1436 = dma.vmem_to_hbm [thread:$0]  (%p2024_p0), %s1967_s21, 128, %s1965_s25, %s1119_s29  }
 0x555 PF: > { %p1448_p7 = scmp.ge.s32.totalorder %s1671_s28, 2  ;;  %s1144_s20 = sand.u32 1, %s1659_s26  }
 0x556   : > { %p2025_p8 = scmp.ne.s32.totalorder %s2018_s12, 0  ;;  %s1145_s22 = scalar_lea.sflag [#allocation6], %s1144_s20 }
 0x558   : > { %p1443_p9 = pnand %p1448_p7, %p2025_p8 }
 0x55a   : > { %1654 = dma.done.wait (!%p1443_p9), %s1145_s22, 128  }
 0x55b   : > { %1656 = vsyncadd (!%p1443_p9), %s1145_s22, 4294967168  ;;  %p23_p12 = scmp.ge.s32.totalorder %s1745_s7, 4   ;;  %s2026_s26 = smov %s1663_s27 }
 0x55c   : > { %s2027_s27 = smov %s1667_s0  ;;  %s2028_s0 = smov %s1756_s10 }
 0x55d   : > { %s2029_s28 = smov %s1745_s7  ;;  %25 = sbr.rel (!%p23_p12) target bundleno = 19 (0x13), region = 89 }
 0x564   :  { %1150 = vsyncpa [#allocation5], 1 }
 0x565   :  { %1152 = vsyncpa [#allocation5 + $0x1], 1 }
 0x566   :  { %1153 = vsyncpa [#allocation6], 1 }
 0x567   :  { %1155 = vsyncpa [#allocation6 + $0x1], 1 }

</bundles_post_ra>
